<compile_context>
chip_gen: v6e
topology: v6e:2x2x1
jax: 0.10.0
libtpu: 0.0.40
codegen_flags: <defaults>
</compile_context>

<pallas_src>
import functools

import numpy as np
import jax
import jax.numpy as jnp
from jax.experimental import pallas as pl
from jax.experimental.pallas import tpu as pltpu


def _round_up(v, m):
    return ((v + m - 1) // m) * m


def noisy_linear_kernel(x_ref, ein_ref, wmu_ref, wsig_ref, eout_ref,
                        bmu_ref, bsig_ref, beps_ref, o_ref, acc_sig_ref,
                        *, tk, x_resident, weights_dtype):
    k = pl.program_id(1)

    @pl.when(k == 0)
    def _():
        o_ref[...] = jnp.zeros_like(o_ref)
        acc_sig_ref[...] = jnp.zeros_like(acc_sig_ref)

    # K-chunk offset (tk is a multiple of 128 -> aligned slice).
    koff = pl.multiple_of(k * tk, tk)
    if x_resident:
        x = x_ref[:, pl.ds(koff, tk)]          # x resident: one DMA per call
    else:
        x = x_ref[...]                          # x tiled: (B, tk) block
    ein = ein_ref[:, pl.ds(koff, tk)]           # (1, tk) f32, resident
    xs = x * ein                                # (B, tk) f32 VPU (v5e-safe)

    if np.dtype(weights_dtype) != np.dtype(jnp.float32):
        # bf16 weight-streaming path: only the MXU operands are converted;
        # all elementwise math and accumulation stay f32.
        x = x.astype(weights_dtype)
        xs = xs.astype(weights_dtype)

    contract = (((1,), (0,)), ((), ()))         # (B,K) @ (K,N)
    # mu path accumulates directly into the resident f32 output block.
    o_ref[...] += jax.lax.dot_general(
        x, wmu_ref[...], contract, preferred_element_type=jnp.float32)
    # sigma path: (x * eps_in) @ w_sigma, eps_out applied at finalize.
    acc_sig_ref[...] += jax.lax.dot_general(
        xs, wsig_ref[...], contract, preferred_element_type=jnp.float32)

    @pl.when(k == pl.num_programs(1) - 1)
    def _():
        bias = bmu_ref[...] + bsig_ref[...] * beps_ref[...]        # (1, tn) f32
        o_ref[...] = o_ref[...] + eout_ref[...] * acc_sig_ref[...] + bias


def prepare_noisy_linear(weight_mu, weight_sigma, epsilon_in, epsilon_out,
                         bias_mu, bias_sigma, bias_epsilon,
                         *, tn=256, tk=512, weights_dtype=jnp.float32):
    """One-time (per reset_noise / per parameter update) preparation.

    Pads + transposes the weights to a lane-aligned (K, N) layout and casts
    them to the HBM streaming dtype ONCE, so the per-forward wrapper never
    re-materializes full padded weight copies.
    """
    out_features, in_features = weight_mu.shape
    tk = max(128, min(tk, _round_up(in_features, 128)))
    tn = max(128, min(tn, _round_up(out_features, 128)))
    K = _round_up(in_features, tk)
    N = _round_up(out_features, tn)
    f32 = jnp.float32

    wmu_kn = (jnp.zeros((K, N), weights_dtype)
              .at[:in_features, :out_features]
              .set(jnp.asarray(weight_mu, f32).T.astype(weights_dtype)))
    wsig_kn = (jnp.zeros((K, N), weights_dtype)
               .at[:in_features, :out_features]
               .set(jnp.asarray(weight_sigma, f32).T.astype(weights_dtype)))
    ein = jnp.zeros((1, K), f32).at[0, :in_features].set(epsilon_in)
    eout = jnp.zeros((1, N), f32).at[0, :out_features].set(epsilon_out)
    bmu = jnp.zeros((1, N), f32).at[0, :out_features].set(bias_mu)
    bsig = jnp.zeros((1, N), f32).at[0, :out_features].set(bias_sigma)
    beps = jnp.zeros((1, N), f32).at[0, :out_features].set(bias_epsilon)

    return dict(wmu=wmu_kn, wsig=wsig_kn, ein=ein, eout=eout,
                bmu=bmu, bsig=bsig, beps=beps,
                tn=tn, tk=tk, K=K, N=N,
                in_features=in_features, out_features=out_features,
                weights_dtype=weights_dtype)


def noisy_linear(x, params, *, x_resident_budget_bytes=4 << 20):
    """NoisyLinear forward: (batch, in_features) -> (batch, out_features) f32."""
    batch, in_features = x.shape
    assert in_features == params["in_features"]
    tn, tk = params["tn"], params["tk"]
    K, N = params["K"], params["N"]
    out_features = params["out_features"]

    B = _round_up(batch, 8)
    x_p = (jnp.zeros((B, K), jnp.float32)
           .at[:batch, :in_features].set(x.astype(jnp.float32)))

    # Keep x resident in VMEM (single DMA) when it fits a conservative budget
    # (safe on v7x's 32 MiB scoped default alongside double-buffered weights).
    x_resident = (B * K * 4) <= x_resident_budget_bytes
    if x_resident:
        x_spec = pl.BlockSpec((B, K), lambda i, k: (0, 0))
    else:
        x_spec = pl.BlockSpec((B, tk), lambda i, k: (0, k))

    grid = (N // tn, K // tk)   # (output tiles: parallel, K reduction: arbitrary)

    out = pl.pallas_call(
        functools.partial(noisy_linear_kernel, tk=tk, x_resident=x_resident,
                          weights_dtype=params["weights_dtype"]),
        out_shape=jax.ShapeDtypeStruct((B, N), jnp.float32),
        grid_spec=pltpu.PrefetchScalarGridSpec(
            num_scalar_prefetch=0,
            grid=grid,
            in_specs=[
                x_spec,                                          # x
                pl.BlockSpec((1, K), lambda i, k: (0, 0)),       # eps_in  (resident row)
                pl.BlockSpec((tk, tn), lambda i, k: (k, i)),     # weight_mu   (K, N)
                pl.BlockSpec((tk, tn), lambda i, k: (k, i)),     # weight_sigma(K, N)
                pl.BlockSpec((1, tn), lambda i, k: (0, i)),      # eps_out (lane-dense row)
                pl.BlockSpec((1, tn), lambda i, k: (0, i)),      # bias_mu
                pl.BlockSpec((1, tn), lambda i, k: (0, i)),      # bias_sigma
                pl.BlockSpec((1, tn), lambda i, k: (0, i)),      # bias_epsilon
            ],
            # Output block index is (0, i): resident across the K axis so the
            # kernel accumulates the mu-path matmul directly into o_ref.
            out_specs=pl.BlockSpec((B, tn), lambda i, k: (0, i)),
            scratch_shapes=[pltpu.VMEM((B, tn), jnp.float32)],   # sigma-path acc
        ),
        compiler_params=pltpu.CompilerParams(
            dimension_semantics=("parallel", "arbitrary")),
    )(x_p, params["ein"], params["wmu"], params["wsig"], params["eout"],
      params["bmu"], params["bsig"], params["beps"])

    return out[:batch, :out_features]


def _scale_noise(key, size):
    # x.sign() * sqrt(|x|), x ~ N(0,1)   (matches NoisyLinear._scale_noise)
    x = jax.random.normal(key, (size,), dtype=jnp.float32)
    return jnp.sign(x) * jnp.sqrt(jnp.abs(x))


def init_noisy_linear_params(key, in_features, out_features, sigma_init=0.5):
    k_wmu, k_bmu, k_ein, k_eout = jax.random.split(key, 4)
    mu_range = 1.0 / np.sqrt(in_features)

    weight_mu = jax.random.uniform(k_wmu, (out_features, in_features),
                                   minval=-mu_range, maxval=mu_range,
                                   dtype=jnp.float32)
    weight_sigma = jnp.full((out_features, in_features),
                            sigma_init / np.sqrt(in_features), jnp.float32)
    bias_mu = jax.random.uniform(k_bmu, (out_features,),
                                 minval=-mu_range, maxval=mu_range,
                                 dtype=jnp.float32)
    bias_sigma = jnp.full((out_features,),
                          sigma_init / np.sqrt(out_features), jnp.float32)

    epsilon_in = _scale_noise(k_ein, in_features)
    epsilon_out = _scale_noise(k_eout, out_features)
    bias_epsilon = epsilon_out    # reset_noise(): bias_epsilon.copy_(epsilon_out)

    return (weight_mu, weight_sigma, epsilon_in, epsilon_out,
            bias_mu, bias_sigma, bias_epsilon)


if __name__ == "__main__":
    key = jax.random.PRNGKey(0)
    k_params, k_x = jax.random.split(key)

    # Small, deliberately non-aligned shapes to exercise padding + the grid.
    batch, in_features, out_features = 5, 200, 300
    (wmu, wsig, eps_in, eps_out, bmu, bsig, beps) = init_noisy_linear_params(
        k_params, in_features, out_features)
    x = jax.random.normal(k_x, (batch, in_features), dtype=jnp.float32)

    # Pure-JAX reference (matches PyTorch NoisyLinear.forward exactly).
    w_ref = wmu + wsig * jnp.outer(eps_out, eps_in)   # torch.ger(eps_out, eps_in)
    b_ref = bmu + bsig * beps
    ref = jnp.dot(x, w_ref.T, precision=jax.lax.Precision.HIGHEST) + b_ref

    # f32 weight-streaming path (module-faithful semantics); grid (3, 2).
    p_f32 = prepare_noisy_linear(wmu, wsig, eps_in, eps_out, bmu, bsig, beps,
                                 tn=128, tk=128, weights_dtype=jnp.float32)
    out = jax.block_until_ready(noisy_linear(x, p_f32))
    np.testing.assert_allclose(np.asarray(out), np.asarray(ref),
                               rtol=1e-3, atol=1e-3)

    # bf16 weight-streaming path (halves weight HBM traffic; elementwise math
    # and accumulation stay f32 -> v5e-safe). Looser tolerance: weights are
    # quantized to bf16 once at prepare time.
    p_bf16 = prepare_noisy_linear(wmu, wsig, eps_in, eps_out, bmu, bsig, beps,
                                  tn=128, tk=128, weights_dtype=jnp.bfloat16)
    out_bf16 = jax.block_until_ready(noisy_linear(x, p_bf16))
    np.testing.assert_allclose(np.asarray(out_bf16), np.asarray(ref),
                               rtol=5e-2, atol=5e-2)

    print("KERNEL_OK")
</pallas_src>

<mosaic_0001>
module attributes {stable_mosaic.version = 11 : i64} {
  func.func @noisy_linear_kernel(%arg0: i32, %arg1: i32, %arg2: memref<8x256xf32, #tpu.memory_space<vmem>>, %arg3: memref<1x256xf32, #tpu.memory_space<vmem>>, %arg4: memref<128x128xf32, #tpu.memory_space<vmem>>, %arg5: memref<128x128xf32, #tpu.memory_space<vmem>>, %arg6: memref<1x128xf32, #tpu.memory_space<vmem>>, %arg7: memref<1x128xf32, #tpu.memory_space<vmem>>, %arg8: memref<1x128xf32, #tpu.memory_space<vmem>>, %arg9: memref<1x128xf32, #tpu.memory_space<vmem>>, %arg10: memref<8x128xf32, #tpu.memory_space<vmem>>, %arg11: memref<8x128xf32, #tpu.memory_space<vmem>>) attributes {dimension_semantics = [#tpu.dimension_semantics<parallel>, #tpu.dimension_semantics<arbitrary>], iteration_bounds = array<i64: 3, 2>, scalar_prefetch = 0 : i64, scratch_operands = 1 : i64, tpu.core_type = #tpu.core_type<tc>, window_params = [{pipeline_mode = #tpu.pipeline_mode<synchronous>, transform_indices = @transform_0, window_bounds = array<i64: 8, 256>}, {pipeline_mode = #tpu.pipeline_mode<synchronous>, transform_indices = @transform_1, window_bounds = array<i64: 1, 256>}, {transform_indices = @transform_2, window_bounds = array<i64: 128, 128>}, {transform_indices = @transform_3, window_bounds = array<i64: 128, 128>}, {transform_indices = @transform_4, window_bounds = array<i64: 1, 128>}, {transform_indices = @transform_5, window_bounds = array<i64: 1, 128>}, {transform_indices = @transform_6, window_bounds = array<i64: 1, 128>}, {transform_indices = @transform_7, window_bounds = array<i64: 1, 128>}, {transform_indices = @transform_8, window_bounds = array<i64: 8, 128>}]} {
    %c0_i32 = arith.constant 0 : i32
    %0 = arith.cmpi eq, %arg1, %c0_i32 : i32
    %1 = arith.extui %0 : i1 to i32
    %c0_i32_0 = arith.constant 0 : i32
    %2 = arith.cmpi ne, %1, %c0_i32_0 : i32
    scf.if %2 {
      %cst_16 = arith.constant 0.000000e+00 : f32
      %24 = vector.broadcast %cst_16 : f32 to vector<8x128xf32>
      %c0_17 = arith.constant 0 : index
      %c0_18 = arith.constant 0 : index
      %25 = vector.load %arg10[%c0_17, %c0_18] : memref<8x128xf32, #tpu.memory_space<vmem>>, vector<8x128xf32>
      tpu.vector_store %arg10[%c0_17, %c0_18], %24 {strides = array<i32>} : memref<8x128xf32, #tpu.memory_space<vmem>>, vector<8x128xf32>,
      %cst_19 = arith.constant 0.000000e+00 : f32
      %26 = vector.broadcast %cst_19 : f32 to vector<8x128xf32>
      %c0_20 = arith.constant 0 : index
      %c0_21 = arith.constant 0 : index
      %27 = vector.load %arg11[%c0_20, %c0_21] : memref<8x128xf32, #tpu.memory_space<vmem>>, vector<8x128xf32>
      tpu.vector_store %arg11[%c0_20, %c0_21], %26 {strides = array<i32>} : memref<8x128xf32, #tpu.memory_space<vmem>>, vector<8x128xf32>,
    } else {
    }
    %c128_i32 = arith.constant 128 : i32
    %3 = arith.muli %arg1, %c128_i32 : i32
    %4 = tpu.assume_multiple %3, 128 : i32
    %c0 = arith.constant 0 : index
    %5 = arith.index_cast %4 : i32 to index
    %6 = vector.load %arg2[%c0, %5] : memref<8x256xf32, #tpu.memory_space<vmem>>, vector<8x128xf32>
    %c0_1 = arith.constant 0 : index
    %7 = arith.index_cast %4 : i32 to index
    %8 = vector.load %arg3[%c0_1, %7] : memref<1x256xf32, #tpu.memory_space<vmem>>, vector<1x128xf32>
    %9 = vector.broadcast %8 : vector<1x128xf32> to vector<8x128xf32>
    %10 = arith.mulf %6, %9 : vector<8x128xf32>
    %c0_2 = arith.constant 0 : index
    %c0_3 = arith.constant 0 : index
    %11 = vector.load %arg10[%c0_2, %c0_3] : memref<8x128xf32, #tpu.memory_space<vmem>>, vector<8x128xf32>
    %c0_4 = arith.constant 0 : index
    %c0_5 = arith.constant 0 : index
    %12 = vector.load %arg4[%c0_4, %c0_5] : memref<128x128xf32, #tpu.memory_space<vmem>>, vector<128x128xf32>
    %cst = arith.constant dense<0.000000e+00> : vector<8x128xf32>
    %13 = tpu.matmul %6, %12, %cst {dimension_numbers = #tpu.dot_dimension_numbers<[1], [0], [0], [1], [0, 0, 1, 1], [], []>} : vector<8x128xf32>, vector<128x128xf32>, vector<8x128xf32> -> vector<8x128xf32>
    %14 = arith.addf %11, %13 : vector<8x128xf32>
    %c0_6 = arith.constant 0 : index
    %c0_7 = arith.constant 0 : index
    %15 = vector.load %arg10[%c0_6, %c0_7] : memref<8x128xf32, #tpu.memory_space<vmem>>, vector<8x128xf32>
    tpu.vector_store %arg10[%c0_6, %c0_7], %14 {strides = array<i32>} : memref<8x128xf32, #tpu.memory_space<vmem>>, vector<8x128xf32>,
    %c0_8 = arith.constant 0 : index
    %c0_9 = arith.constant 0 : index
    %16 = vector.load %arg11[%c0_8, %c0_9] : memref<8x128xf32, #tpu.memory_space<vmem>>, vector<8x128xf32>
    %c0_10 = arith.constant 0 : index
    %c0_11 = arith.constant 0 : index
    %17 = vector.load %arg5[%c0_10, %c0_11] : memref<128x128xf32, #tpu.memory_space<vmem>>, vector<128x128xf32>
    %cst_12 = arith.constant dense<0.000000e+00> : vector<8x128xf32>
    %18 = tpu.matmul %10, %17, %cst_12 {dimension_numbers = #tpu.dot_dimension_numbers<[1], [0], [0], [1], [0, 0, 1, 1], [], []>} : vector<8x128xf32>, vector<128x128xf32>, vector<8x128xf32> -> vector<8x128xf32>
    %19 = arith.addf %16, %18 : vector<8x128xf32>
    %c0_13 = arith.constant 0 : index
    %c0_14 = arith.constant 0 : index
    %20 = vector.load %arg11[%c0_13, %c0_14] : memref<8x128xf32, #tpu.memory_space<vmem>>, vector<8x128xf32>
    tpu.vector_store %arg11[%c0_13, %c0_14], %19 {strides = array<i32>} : memref<8x128xf32, #tpu.memory_space<vmem>>, vector<8x128xf32>,
    %c1_i32 = arith.constant 1 : i32
    %21 = arith.cmpi eq, %arg1, %c1_i32 : i32
    %22 = arith.extui %21 : i1 to i32
    %c0_i32_15 = arith.constant 0 : i32
    %23 = arith.cmpi ne, %22, %c0_i32_15 : i32
    scf.if %23 {
      %c0_16 = arith.constant 0 : index
      %c0_17 = arith.constant 0 : index
      %24 = vector.load %arg7[%c0_16, %c0_17] : memref<1x128xf32, #tpu.memory_space<vmem>>, vector<1x128xf32>
      %c0_18 = arith.constant 0 : index
      %c0_19 = arith.constant 0 : index
      %25 = vector.load %arg8[%c0_18, %c0_19] : memref<1x128xf32, #tpu.memory_space<vmem>>, vector<1x128xf32>
      %c0_20 = arith.constant 0 : index
      %c0_21 = arith.constant 0 : index
      %26 = vector.load %arg9[%c0_20, %c0_21] : memref<1x128xf32, #tpu.memory_space<vmem>>, vector<1x128xf32>
      %27 = arith.mulf %25, %26 : vector<1x128xf32>
      %28 = arith.addf %24, %27 : vector<1x128xf32>
      %c0_22 = arith.constant 0 : index
      %c0_23 = arith.constant 0 : index
      %29 = vector.load %arg10[%c0_22, %c0_23] : memref<8x128xf32, #tpu.memory_space<vmem>>, vector<8x128xf32>
      %c0_24 = arith.constant 0 : index
      %c0_25 = arith.constant 0 : index
      %30 = vector.load %arg6[%c0_24, %c0_25] : memref<1x128xf32, #tpu.memory_space<vmem>>, vector<1x128xf32>
      %c0_26 = arith.constant 0 : index
      %c0_27 = arith.constant 0 : index
      %31 = vector.load %arg11[%c0_26, %c0_27] : memref<8x128xf32, #tpu.memory_space<vmem>>, vector<8x128xf32>
      %32 = vector.broadcast %30 : vector<1x128xf32> to vector<8x128xf32>
      %33 = arith.mulf %32, %31 : vector<8x128xf32>
      %34 = arith.addf %29, %33 : vector<8x128xf32>
      %35 = vector.broadcast %28 : vector<1x128xf32> to vector<8x128xf32>
      %36 = arith.addf %34, %35 : vector<8x128xf32>
      %c0_28 = arith.constant 0 : index
      %c0_29 = arith.constant 0 : index
      %37 = vector.load %arg10[%c0_28, %c0_29] : memref<8x128xf32, #tpu.memory_space<vmem>>, vector<8x128xf32>
      tpu.vector_store %arg10[%c0_28, %c0_29], %36 {strides = array<i32>} : memref<8x128xf32, #tpu.memory_space<vmem>>, vector<8x128xf32>,
    } else {
    }
    return
  }
  func.func @transform_0(%arg0: i32, %arg1: i32) -> (i32, i32) {
    %c0_i32 = arith.constant 0 : i32
    %c0_i32_0 = arith.constant 0 : i32
    %c0_i32_1 = arith.constant 0 : i32
    return %c0_i32, %c0_i32_0 : i32, i32
  }
  func.func @transform_1(%arg0: i32, %arg1: i32) -> (i32, i32) {
    %c0_i32 = arith.constant 0 : i32
    %c0_i32_0 = arith.constant 0 : i32
    %c0_i32_1 = arith.constant 0 : i32
    return %c0_i32, %c0_i32_0 : i32, i32
  }
  func.func @transform_2(%arg0: i32, %arg1: i32) -> (i32, i32) {
    %c0_i32 = arith.constant 0 : i32
    return %arg1, %arg0 : i32, i32
  }
  func.func @transform_3(%arg0: i32, %arg1: i32) -> (i32, i32) {
    %c0_i32 = arith.constant 0 : i32
    return %arg1, %arg0 : i32, i32
  }
  func.func @transform_4(%arg0: i32, %arg1: i32) -> (i32, i32) {
    %c0_i32 = arith.constant 0 : i32
    %c0_i32_0 = arith.constant 0 : i32
    return %c0_i32, %arg0 : i32, i32
  }
  func.func @transform_5(%arg0: i32, %arg1: i32) -> (i32, i32) {
    %c0_i32 = arith.constant 0 : i32
    %c0_i32_0 = arith.constant 0 : i32
    return %c0_i32, %arg0 : i32, i32
  }
  func.func @transform_6(%arg0: i32, %arg1: i32) -> (i32, i32) {
    %c0_i32 = arith.constant 0 : i32
    %c0_i32_0 = arith.constant 0 : i32
    return %c0_i32, %arg0 : i32, i32
  }
  func.func @transform_7(%arg0: i32, %arg1: i32) -> (i32, i32) {
    %c0_i32 = arith.constant 0 : i32
    %c0_i32_0 = arith.constant 0 : i32
    return %c0_i32, %arg0 : i32, i32
  }
  func.func @transform_8(%arg0: i32, %arg1: i32) -> (i32, i32) {
    %c0_i32 = arith.constant 0 : i32
    %c0_i32_0 = arith.constant 0 : i32
    return %c0_i32, %arg0 : i32, i32
  }
}

</mosaic_0001>

<bundles_post_ra>
// kernel: tpu_custom_call.1
= control target key start
LH: loop header
LB: loop body
LE: loop exit
PB: predicated region body
PF: predicated region fallthrough
CT: control target
= control target key end

     0   :  { %s1811_s0 = inlined_call_operand.hbm [shape: f32[8,256], index: 0, kind: input, shape index: {}]   ;;  %s1812_s1 = inlined_call_operand.hbm [shape: f32[1,256], index: 1, kind: input, shape index: {}]   ;;  %s1813_s2 = inlined_call_operand.hbm [shape: f32[256,384], index: 2, kind: input, shape index: {}]   ;;  %s1814_s3 = inlined_call_operand.hbm [shape: f32[256,384], index: 3, kind: input, shape index: {}]   ;;  %s1815_s4 = inlined_call_operand.vmem [shape: f32[1,384], index: 4, kind: input, shape index: {}]   ;;  %s1816_s5 = inlined_call_operand.vmem [shape: f32[1,384], index: 5, kind: input, shape index: {}]   ;;  %s1817_s6 = inlined_call_operand.vmem [shape: f32[1,384], index: 6, kind: input, shape index: {}]   ;;  %s1818_s7 = inlined_call_operand.vmem [shape: f32[1,384], index: 7, kind: input, shape index: {}]   ;;  %s1819_s8 = inlined_call_operand.hbm [shape: f32[8,384], index: 8, kind: output, shape index: {}]  }
   0x1   :  { %1836 = sst [smem:[#allocation26_spill]] %s1818_s7 }
   0x2   :  { %1837 = sst [smem:[#allocation27_spill]] %s1819_s8 }
   0x3   :  { %13 = vsyncpa [#allocation4], 0 }
   0x4   :  { %14 = vsyncpa [#allocation7], 0 }
   0x5   :  { %15 = vsyncpa [#allocation5], 0 }
   0x6   :  { %17 = vsyncpa [#allocation5 + $0x1], 0  ;;  %s1430_s27 = smov 0   ;;  %s1432_s28 = smov 0  }
   0x7   :  { %s1434_s29 = smov 0   ;;  %s1436_s30 = smov 0  }
   0x8   :  { %s1438_s9 = smov 0   ;;  %s1440_s10 = smov 0  }
   0x9   :  { %s1442_s11 = smov 0   ;;  %s1444_s12 = smov 0  }
   0xa   :  { %s1446_s13 = smov 0   ;;  %s1448_s14 = smov 0  }
   0xb   :  { %s1450_s15 = smov 0  }
   0xc LB: > { %1838 = sst [smem:[#allocation15_spill]] %s1332_s27  ;;  %s1484_s16 = sadd.s32 4294967295, %s1372_s15   ;;  %s1372_s15 = sphi %s1450_s15, %s23_s15   ;;  %s1368_s14 = sphi %s1448_s14, %s1886_s14   ;;  %s1364_s13 = sphi %s1446_s13, %s1885_s13   ;;  %s1360_s12 = sphi %s1444_s12, %s1884_s12   ;;  %s1356_s11 = sphi %s1442_s11, %s1883_s11   ;;  %s1352_s10 = sphi %s1440_s10, %s1876_s10   ;;  %s1348_s9 = sphi %s1438_s9, %s1882_s9   ;;  %s1344_s30 = sphi %s1436_s30, %s1881_s30   ;;  %s1340_s29 = sphi %s1434_s29, %s1874_s29   ;;  %s1336_s28 = sphi %s1432_s28, %s1880_s28   ;;  %s1332_s27 = sphi %s1430_s27, %s1879_s27  }
   0xd   : > { %1839 = sst [smem:[#allocation16_spill]] %s1340_s29  ;;  %s867_s17 = sadd.s32 4294967294, %s1372_s15  }
   0xe   : > { %1840 = sst [smem:[#allocation17_spill]] %s1352_s10  ;;  %s32_s18 = sadd.s32 1, %s1364_s13 }
   0xf   : > { %1841 = sst [smem:[#allocation18_spill]] %s1356_s11  ;;  %s35_s19 = sadd.s32 1, %s1368_s14 }
  0x10   : > { %1842 = sst [smem:[#allocation19_spill]] %s1372_s15  ;;  %p33_p0 = scmp.ge.s32.totalorder %s32_s18, 2 }
  0x11   : > { %s86_s20 = sadd.s32 1, %s1352_s10  ;;  %p93_p1 = scmp.ne.s32.totalorder %s1352_s10, %s1348_s9 }
  0x12   : > { %p94_p2 = scmp.eq.s32.totalorder %s1372_s15, 0  ;;  %s1888_s18 = smov (%p33_p0, %s32_s18), 0 }
  0x13   : > { %1843 = sst [smem:[#allocation20_spill]] %s1888_s18  ;;  %s1890_s19 = smov (!%p33_p0, %s35_s19), %s1368_s14 }
  0x14   : > { %s81_s21 = ssub.s32 %s1364_s13, %s1888_s18  ;;  %p1498_p3 = por %p94_p2, %p93_p1 }
  0x15   : > { %p37_p4 = scmp.ge.s32.totalorder %s1890_s19, 3  ;;  %p99_p5 = scmp.ne.s32.totalorder %s1348_s9, %s1344_s30 }
  0x16   : > { %p1823_p6 = scmp.eq.s32.totalorder %s1484_s16, 0  ;;  %s244_s23 = sadd.s32 1, %s1340_s29 }
  0x17   : > { %s1892_s19 = smov (%p37_p4, %s1890_s19), 0  ;;  %p254_p8 = scmp.ne.s32.totalorder %s1340_s29, %s1336_s28 }
  0x18   : > { %1845 = sst [smem:[#allocation21_spill]] %s1892_s19  ;;  %p1509_p7 = por %p1823_p6, %p99_p5 }
  0x19   : > { %s82_s25 = ssub.s32 %s1368_s14, %s1892_s19  ;;  %p255_p9 = scmp.eq.s32.totalorder %s1484_s16, 5 }
  0x1a   : > { %s83_s26 = sor.u32 %s82_s25, %s81_s21  ;;  %p242_p10 = scmp.eq.s32.totalorder %s82_s25, 0 }
  0x1b   : > { %p84_p11 = scmp.eq.s32.totalorder %s83_s26, 0  ;;  %p1518_p12 = por %p255_p9, %p254_p8 }
  0x1c   : > { %s1523_s18 = scalar_select %p242_p10, %s1340_s29, %s244_s23  }
  0x1d   : > { %s1847_s30 = scalar_select %p1518_p12, 1, 0 }
  0x1e   : > { %1849 = sst [smem:[#allocation23_spill]] %s1523_s18  ;;  %p260_p13 = scmp.ne.s32.totalorder %s1336_s28, %s1332_s27 }
  0x1f   : > { %1848 = sst [smem:[#allocation22_spill]] %s1847_s30  ;;  %p261_p0 = scmp.eq.s32.totalorder %s867_s17, 5 }
  0x20   : > { %s1526_s8 = scalar_select %p84_p11, %s1352_s10, %s86_s20  }
  0x21   : > { %p868_p1 = scmp.ge.s32.totalorder %s1372_s15, 1  ;;  %p268_p2 = scmp.lt.s32.totalorder %s1372_s15, 7 }
  0x22   : > { %1850 = sst [smem:[#allocation24_spill]] %s1526_s8  ;;  %p1532_p4 = por %p261_p0, %p260_p13 }
  0x23   : > { %p1536_p5 = pnand %p868_p1, %p268_p2  ;;  %s1374_s26 = smov [#allocation3]  }
  0x24   : > { %s1851_s21 = scalar_select %p1532_p4, 1, 0 }
  0x25   : > { %s281_s19 = sshll.u32 %s1374_s26, 4  ;;  %p1016_p8 = pneg %p1536_p5  ;;  %s282_s19 = int_to_ptr.vmem [resolvable:$true] %s281_s19 }
  0x26   : > { %1852 = sst [smem:[#allocation25_spill]] %s1851_s21  ;;  %p1036_p9 = scmp.lt.s32.totalorder %s1372_s15, 6 }
  0x27   : > { %s303_s20 = sand.u32 1, %s1372_s15   ;;  %p1546_p10 = pnand %p1016_p8, %p1823_p6 }
  0x28   : > { %p1552_p11 = pnand %p1036_p9, %p1498_p3  ;;  %s305_s8 = sand.u32 1, %s1352_s10  }
  0x29   : > { %s1557_s18 = sshll.u32 %s305_s8, 7  ;;  %p1138_p13 = pneg %p1546_p10 }
  0x2a   : > { %s1147_s26 = scalar_lea.vmem %s282_s19, 256  ;;  %p1155_p8 = scmp.lt.s32.totalorder %s282_s19, %s282_s19 }
  0x2b   : > { %p1148_p0 = scmp.ne.s32.totalorder %s282_s19, %s1147_s26  ;;  %p1156_p6 = scmp.lt.s32.totalorder %s1147_s26, %s1147_s26 }
  0x2d   : > { %p1150_p1 = pnand %p1148_p0, %p1138_p13  ;;  %p1157_p4 = por %p1156_p6, %p1155_p8 }
  0x2f   : > { %p1151_p2 = pneg %p1150_p1 }
  0x31   : > { %p1158_p12 = pnand %p1157_p4, %p1151_p2 }
  0x33   : > { %1161 = shalt.err (!%p1158_p12)
}
  0x34   : > { %1019 = dma.hbm_to_vmem [thread:$0]  (!%p1546_p10), %s1811_s0, 256, %s282_s19, [#allocation4]  }
  0x35   : > { %s1000_s8 = smul.u32 48, %s1364_s13  ;;  %s307_s10 = scalar_lea.vmem [#allocation8], %s1557_s18 }
  0x36   : > { %s316_s21 = sshll.u32 %s307_s10, 4  ;;  %s1575_s7 = scalar_lea.sflag [#allocation4], %s303_s20  ;;  %s317_s21 = int_to_ptr.vmem [resolvable:$true] %s316_s21 }
  0x37   : > { %s313_s27 = sadd.s32 %s1368_s14, %s1000_s8  ;;  %p1164_p3 = pneg %p1552_p11 }
  0x38   : > { %s875_s26 = sshll.u32 %s313_s27, 7  ;;  %s1175_s29 = scalar_lea.vmem %s317_s21, 2048 }
  0x39   : > { %s315_s11 = scalar_lea.hbm %s1813_s2, %s875_s26  ;;  %p1176_p6 = scmp.ne.s32.totalorder %s317_s21, %s1175_s29 }
  0x3a   : > { %s1375_s19 = smov [#allocation8]  }
  0x3b   : > { %p1178_p12 = pnand %p1176_p6, %p1164_p3  ;;  %s1180_s22 = sshll.u32 %s1375_s19, 4  ;;  %s1181_s22 = int_to_ptr.vmem [resolvable:$false] %s1180_s22 }
  0x3c   : > { %s1182_s10 = scalar_lea.vmem %s1181_s22, 4096  ;;  %p1183_p9 = scmp.lt.s32.totalorder %s317_s21, %s1181_s22 }
  0x3d   : > { %p1179_p4 = pneg %p1178_p12  ;;  %p1184_p0 = scmp.lt.s32.totalorder %s1182_s10, %s1175_s29 }
  0x3f   : > { %p1185_p1 = por %p1184_p0, %p1183_p9 }
  0x41   : > { %p1186_p2 = pnand %p1185_p1, %p1179_p4 }
  0x43   : > { %1189 = shalt.err (!%p1186_p2)
}
  0x44   : > { %s1834_s27 = smov 384   ;;  %s1377_s15 = smov 128  }
  0x45   : > { %s1378_s30 = smov 8   ;;  %s1379_s20 = smov [#allocation6]  }
  0x46   : > { %1026 = dma.hbm_to_vmem [thread:$0]  (!%p1552_p11), %s315_s11, 2048, %s317_s21, %s1575_s7, %s1834_s27, %s1377_s15, %s1378_s30  }
  0x47   : > { %s292_s8 = sshll.u32 %s1379_s20, 4  ;;  %s1591_s29 = scalar_lea.hbm %s1814_s3, %s875_s26  ;;  %s293_s8 = int_to_ptr.vmem [resolvable:$true] %s292_s8 }
  0x48   : > { %s1201_s10 = scalar_lea.vmem %s293_s8, 32  ;;  %p1209_p4 = scmp.lt.s32.totalorder %s293_s8, %s293_s8 }
  0x49   : > { %p1202_p8 = scmp.ne.s32.totalorder %s293_s8, %s1201_s10  ;;  %p1210_p9 = scmp.lt.s32.totalorder %s1201_s10, %s1201_s10 }
  0x4b   : > { %p1204_p6 = pnand %p1202_p8, %p1138_p13  ;;  %p1211_p0 = por %p1210_p9, %p1209_p4 }
  0x4d   : > { %p1205_p12 = pneg %p1204_p6 }
  0x4f   : > { %p1212_p1 = pnand %p1211_p0, %p1205_p12 }
  0x51   : > { %1215 = shalt.err (!%p1212_p1)
}
  0x52   : > { %1022 = dma.hbm_to_vmem [thread:$0]  (!%p1546_p10), %s1812_s1, 32, %s293_s8, [#allocation7]  }
  0x53   : > { %s330_s26 = scalar_lea.vmem [#allocation9], %s1557_s18  ;;  %s1380_s22 = smov [#allocation9]  }
  0x54   : > { %s339_s20 = sshll.u32 %s330_s26, 4  ;;  %s1234_s10 = sshll.u32 %s1380_s22, 4  ;;  %s340_s20 = int_to_ptr.vmem [resolvable:$true] %s339_s20  ;;  %s1235_s10 = int_to_ptr.vmem [resolvable:$false] %s1234_s10 }
  0x55   : > { %s1229_s19 = scalar_lea.vmem %s340_s20, 2048  ;;  %s1236_s27 = scalar_lea.vmem %s1235_s10, 4096 }
  0x56   : > { %p1230_p2 = scmp.ne.s32.totalorder %s340_s20, %s1229_s19  ;;  %p1237_p6 = scmp.lt.s32.totalorder %s340_s20, %s1235_s10 }
  0x57   : > { %p1238_p12 = scmp.lt.s32.totalorder %s1236_s27, %s1229_s19 }
  0x58   : > { %p1232_p13 = pnand %p1230_p2, %p1164_p3 }
  0x59   : > { %p1239_p4 = por %p1238_p12, %p1237_p6 }
  0x5a   : > { %p1233_p8 = pneg %p1232_p13 }
  0x5c   : > { %p1240_p9 = pnand %p1239_p4, %p1233_p8 }
  0x5e   : > { %1243 = shalt.err (!%p1240_p9)
}
  0x5f   : > { %s1856_s18 = smov 384   ;;  %375 = sbr.rel (%p1536_p5) target bundleno = 400 (0x190), region = 52 }
  0x60   : > { %1029 = dma.hbm_to_vmem [thread:$0]  (!%p1552_p11), %s1591_s29, 2048, %s340_s20, %s1575_s7, %s1856_s18, %s1377_s15, %s1378_s30  }
  0x61   : > { %p1857_p10 = scmp.eq.s32.totalorder (!%p1536_p5), %s1484_s16, 0 }
  0x64   : > { %1315 = dma.done.wait (%p1857_p10), [#allocation4], 256   ;;  %p1858_p3 = pmov %p1857_p10 }
  0x66   : > { %1317 = vsyncadd (%p1858_p3), [#allocation4], 4294967040  ;;  %p1859_p0 = pmov %p1858_p3 }
  0x68   : > { %1319 = dma.done.wait (%p1859_p0), [#allocation7], 32   ;;  %p1860_p1 = pmov %p1859_p0 }
  0x69   : > { %s385_s17 = sand.u32 1, %s1484_s16   ;;  %s387_s7 = sand.u32 1, %s1348_s9  }
  0x6a   : > { %1321 = vsyncadd (%p1860_p1), [#allocation7], 4294967264  ;;  %s883_s23 = sshll.u32 %s387_s7, 7  ;;  %s386_s25 = scalar_lea.sflag [#allocation4], %s385_s17 }
  0x6b   : > { %s1624_s27 = scalar_lea.vmem [#allocation8], %s883_s23 }
  0x6c   : > { %1323 = dma.done.wait (%p1509_p7), %s386_s25, 4096  }
  0x6d   : > { %1325 = vsyncadd (%p1509_p7), %s386_s25, 4294963200  ;;  %s1835_s15 = sand.u32 1, %s1336_s28   ;;  %p450_p5 = scmp.lt.s32.totalorder %s1360_s12, 2 }
  0x6e   : > { %s885_s30 = sshll.u32 %s1835_s15, 3  ;;  %s1861_s17 = sld [smem:[#allocation26_spill]] }
  0x6f   : > { %s1635_s8 = scalar_select %p450_p5, %s1360_s12, 2 }
  0x70   : > { %s1653_s25 = scalar_lea.vmem [#allocation9], %s883_s23  ;;  %s1655_s15 = scalar_lea.vmem [#allocation10], %s885_s30 }
  0x71   : > { %s452_s11 = scalar_lea.vmem %s1815_s4, %s1635_s8  ;;  %s455_s26 = scalar_lea.vmem %s1816_s5, %s1635_s8 }
  0x72   : > { %s458_s22 = scalar_lea.vmem %s1817_s6, %s1635_s8  ;;  %s1862_s16 = sld [smem:[#allocation18_spill]] }
  0x74   : > { %s461_s7 = scalar_lea.vmem %s1861_s17, %s1635_s8 }
  0x78   : > { %p886_p7 = scmp.ne.s32.totalorder %s1862_s16, 0 }
  0x7a   : > { %465 = sbr.rel (%p886_p7) target bundleno = 129 (0x81), region = 72 }
  0x7f   : > { %v1381_v0 = vmov 0.0  }
  0x80   : > { %466 = vst [vmem:[%s1655_s15] sm:$0xff] %v1381_v0  ;;  %467 = vst [vmem:[#allocation2] sm:$0xff] %v1381_v0 }
  0x81 PF: > { %v499_v1 = vld [vmem:[%s1624_s27 + $0x78] sm:$0xff]  ;;  %v1382_v3 = vmov 0.0   ;;  %v498_v4 = vld [vmem:[%s1624_s27 + $0x70] sm:$0xff]  ;;  %v497_v6 = vld [vmem:[%s1624_s27 + $0x68] sm:$0xff]  ;;  %s1863_s23 = sld [smem:[#allocation18_spill]]  ;;  %vm1383_vm0 = vmmov 0  }
  0x82   : > { %v588_v2 = vld [vmem:[%s1653_s25 + $0x78] sm:$0xff]  ;;  %930 = vmatprep.subr.mxu0 %v1382_v3  ;;  %965 = vmatprep.subr.mxu1 %v1382_v3  ;;  %v587_v5 = vld [vmem:[%s1653_s25 + $0x70] sm:$0xff]  ;;  %v586_v7 = vld [vmem:[%s1653_s25 + $0x68] sm:$0xff] }
  0x83   : > { %931 = vmatpush3.msra.mxu0 %v499_v1  ;;  %966 = vmatpush3.msra.mxu1 %v588_v2  ;;  %v496_v8 = vld [vmem:[%s1624_s27 + $0x60] sm:$0xff]  ;;  %v495_v10 = vld [vmem:[%s1624_s27 + $0x58] sm:$0xff]  ;;  %v494_v12 = vld [vmem:[%s1624_s27 + $0x50] sm:$0xff] }
  0x84   : > { %932 = vmatprep.subr.mxu0 %v1382_v3  ;;  %967 = vmatprep.subr.mxu1 %v1382_v3  ;;  %v585_v9 = vld [vmem:[%s1653_s25 + $0x60] sm:$0xff]  ;;  %v584_v11 = vld [vmem:[%s1653_s25 + $0x58] sm:$0xff]  ;;  %v583_v13 = vld [vmem:[%s1653_s25 + $0x50] sm:$0xff] }
  0x85   : > { %933 = vmatpush3.msra.mxu0 %v498_v4  ;;  %968 = vmatpush3.msra.mxu1 %v587_v5  ;;  %v493_v14 = vld [vmem:[%s1624_s27 + $0x48] sm:$0xff]  ;;  %v492_v16 = vld [vmem:[%s1624_s27 + $0x40] sm:$0xff]  ;;  %v491_v18 = vld [vmem:[%s1624_s27 + $0x38] sm:$0xff] }
  0x86   : > { %934 = vmatprep.subr.mxu0 %v1382_v3  ;;  %969 = vmatprep.subr.mxu1 %v1382_v3  ;;  %v582_v15 = vld [vmem:[%s1653_s25 + $0x48] sm:$0xff]  ;;  %v581_v17 = vld [vmem:[%s1653_s25 + $0x40] sm:$0xff]  ;;  %v580_v19 = vld [vmem:[%s1653_s25 + $0x38] sm:$0xff] }
  0x87   : > { %935 = vmatpush3.msra.mxu0 %v497_v6  ;;  %970 = vmatpush3.msra.mxu1 %v586_v7  ;;  %s887_s30 = sshll.u32 %s1863_s23, 7  ;;  %v490_v20 = vld [vmem:[%s1624_s27 + $0x30] sm:$0xff]  ;;  %v489_v22 = vld [vmem:[%s1624_s27 + $0x28] sm:$0xff]  ;;  %v488_v24 = vld [vmem:[%s1624_s27 + $0x20] sm:$0xff]  ;;  %p890_p11 = scmp.ne.s32.totalorder %s1863_s23, 1 }
  0x88   : > { %936 = vmatprep.subr.mxu0 %v1382_v3  ;;  %971 = vmatprep.subr.mxu1 %v1382_v3  ;;  %v579_v21 = vld [vmem:[%s1653_s25 + $0x30] sm:$0xff]  ;;  %s1698_s29 = sshra.s32 %s887_s30, 7  ;;  %v578_v23 = vld [vmem:[%s1653_s25 + $0x28] sm:$0xff]  ;;  %v577_v25 = vld [vmem:[%s1653_s25 + $0x20] sm:$0xff] }
  0x89   : > { %937 = vmatpush3.msra.mxu0 %v496_v8  ;;  %972 = vmatpush3.msra.mxu1 %v585_v9  ;;  %s888_s24 = sshll.u32 %s1698_s29, 3  ;;  %v487_v26 = vld [vmem:[%s1624_s27 + $0x18] sm:$0xff]  ;;  %v486_v28 = vld [vmem:[%s1624_s27 + $0x10] sm:$0xff]  ;;  %v485_v30 = vld [vmem:[%s1624_s27 + $0x8] sm:$0xff]  ;;  %s474_s20 = scalar_lea.vmem [#allocation6], %s1698_s29 }
  0x8a   : > { %938 = vmatprep.subr.mxu0 %v1382_v3  ;;  %973 = vmatprep.subr.mxu1 %v1382_v3  ;;  %v576_v27 = vld [vmem:[%s1653_s25 + $0x18] sm:$0xff]  ;;  %v575_v29 = vld [vmem:[%s1653_s25 + $0x10] sm:$0xff]  ;;  %v574_v31 = vld [vmem:[%s1653_s25 + $0x8] sm:$0xff]  ;;  %s472_s21 = scalar_lea.vmem [#allocation3], %s888_s24 }
  0x8b   : > { %939 = vmatpush3.msra.mxu0 %v495_v10  ;;  %974 = vmatpush3.msra.mxu1 %v584_v11  ;;  %v473_v32 = vld [vmem:[%s472_s21] sm:$0xff] }
  0x8c   : > { %940 = vmatprep.subr.mxu0 %v1382_v3  ;;  %975 = vmatprep.subr.mxu1 %v1382_v3  ;;  %v889_v33 = vld [vmem:[%s474_s20] ss:$0 sm:$0xff] }
  0x8d   : > { %941 = vmatpush3.msra.mxu0 %v494_v12  ;;  %976 = vmatpush3.msra.mxu1 %v583_v13  ;;  %v484_v34 = vld [vmem:[%s1624_s27] sm:$0xff]  ;;  %v482_v36 = vmul.f32 %v889_v33, %v473_v32 }
  0x8e   : > { %942 = vmatprep.subr.mxu0 %v1382_v3  ;;  %977 = vmatprep.subr.mxu1 %v1382_v3  ;;  %v573_v35 = vld [vmem:[%s1653_s25] sm:$0xff] }
  0x8f   : > { %943 = vmatpush3.msra.mxu0 %v493_v14  ;;  %978 = vmatpush3.msra.mxu1 %v582_v15  ;;  %v483_v37 = vld [vmem:[%s1655_s15] sm:$0xff] }
  0x90   : > { %944 = vmatprep.subr.mxu0 %v1382_v3  ;;  %979 = vmatprep.subr.mxu1 %v1382_v3  ;;  %v572_v38 = vld [vmem:[#allocation2] sm:$0xff] }
  0x91   : > { %945 = vmatpush3.msra.mxu0 %v492_v16  ;;  %980 = vmatpush3.msra.mxu1 %v581_v17 }
  0x92   : > { %946 = vmatprep.subr.mxu0 %v1382_v3  ;;  %981 = vmatprep.subr.mxu1 %v1382_v3 }
  0x93   : > { %947 = vmatpush3.msra.mxu0 %v491_v18  ;;  %982 = vmatpush3.msra.mxu1 %v580_v19 }
  0x94   : > { %948 = vmatprep.subr.mxu0 %v1382_v3  ;;  %983 = vmatprep.subr.mxu1 %v1382_v3 }
  0x95   : > { %949 = vmatpush3.msra.mxu0 %v490_v20  ;;  %984 = vmatpush3.msra.mxu1 %v579_v21 }
  0x96   : > { %950 = vmatprep.subr.mxu0 %v1382_v3  ;;  %985 = vmatprep.subr.mxu1 %v1382_v3 }
  0x97   : > { %951 = vmatpush3.msra.mxu0 %v489_v22  ;;  %986 = vmatpush3.msra.mxu1 %v578_v23 }
  0x98   : > { %952 = vmatprep.subr.mxu0 %v1382_v3  ;;  %987 = vmatprep.subr.mxu1 %v1382_v3 }
  0x99   : > { %953 = vmatpush3.msra.mxu0 %v488_v24  ;;  %988 = vmatpush3.msra.mxu1 %v577_v25 }
  0x9a   : > { %954 = vmatprep.subr.mxu0 %v1382_v3  ;;  %989 = vmatprep.subr.mxu1 %v1382_v3 }
  0x9b   : > { %955 = vmatpush3.msra.mxu0 %v487_v26  ;;  %990 = vmatpush3.msra.mxu1 %v576_v27 }
  0x9c   : > { %956 = vmatprep.subr.mxu0 %v1382_v3  ;;  %991 = vmatprep.subr.mxu1 %v1382_v3 }
  0x9d   : > { %957 = vmatpush3.msra.mxu0 %v486_v28  ;;  %992 = vmatpush3.msra.mxu1 %v575_v29 }
  0x9e   : > { %958 = vmatprep.subr.mxu0 %v1382_v3  ;;  %993 = vmatprep.subr.mxu1 %v1382_v3 }
  0x9f   : > { %959 = vmatpush3.msra.mxu0 %v485_v30  ;;  %994 = vmatpush3.msra.mxu1 %v574_v31 }
  0xa0   : > { %960 = vmatprep.subr.mxu0 %v1382_v3  ;;  %995 = vmatprep.subr.mxu1 %v1382_v3 }
  0xa1   : > { %961 = vmatpush3.msra.mxu0 %v484_v34  ;;  %962 = vmatprep.mubr.msk.f32.mxu0 %vm1383_vm0, %v1382_v3 }
  0xa2   : > { %996 = vmatpush3.msra.mxu1 %v573_v35  ;;  %997 = vmatprep.mubr.msk.f32.mxu1 %vm1383_vm0, %v1382_v3 }
  0xa3   : > { %963 = vmatmul.mubr.f32.vlgmr.msra.gmra.mxu0 %v473_v32  ;;  %998 = vmatmul.mubr.f32.vlgmr.msra.gmra.mxu1 %v482_v36 }
 0x162   : > { %664 = sbr.rel (%p890_p11) target bundleno = 374 (0x176), region = 76 }
 0x163   : > { %v566_v39 = vpop.f32.mrf.mxu0  ;;  %v655_v40 = vpop.f32.mrf.mxu1 }
 0x164   : > { %v570_v41 = vadd.f32 %v566_v39, %v483_v37  ;;  %v659_v42 = vadd.f32 %v655_v40, %v572_v38 }
 0x165   : > { %v964_v43 = vpop.f32.mrf.mxu0  ;;  %v999_v44 = vpop.f32.mrf.mxu1 }
 0x166   : > { %571 = vst [vmem:[%s1655_s15] sm:$0xff] %v570_v41  ;;  %660 = vst [vmem:[#allocation2] sm:$0xff] %v659_v42 }
 0x167   : > { %v665_v45 = vld [vmem:[%s455_s26] sm:$0x1]  ;;  %v682_v48 = vlaneseq }
 0x168   : > { %v666_v46 = vld [vmem:[%s458_s22] sm:$0x1] }
 0x169   : > { %v667_v47 = vld [vmem:[%s461_s7] sm:$0x1]  ;;  %v683_v54 = vshrl.u32 %v682_v48, 7 }
 0x16a   : > { %v668_v49 = vmul.f32 %v667_v47, %v666_v46  ;;  %v891_v51 = vld [vmem:[%s452_s11] ss:$0 sm:$0xff] }
 0x16b   : > { %v684_v57 = vsub.s32 0, %v683_v54 }
 0x16c   : > { %v669_v55 = vadd.f32 %v668_v49, %v665_v45 }
 0x16d   : > { %v670_v50 = vld [vmem:[%s1655_s15] sm:$0xff] }
 0x16e   : > { %v672_v52 = vld [vmem:[#allocation2] sm:$0xff]  ;;  %v685_v58 = vrot.slane %v669_v55, %v684_v57 }
 0x16f   : > { %v679_v53 = vmul.f32 %v891_v51, %v672_v52 }
 0x171   : > { %v680_v56 = vadd.f32 %v679_v53, %v670_v50 }
 0x173   : > { %v687_v59 = vadd.f32 %v685_v58, %v680_v56 }
 0x175   : > { %688 = vst [vmem:[%s1655_s15] sm:$0xff] %v687_v59 }
 0x176 PF: > { %s1865_s26 = sld [smem:[#allocation22_spill]]  ;;  %s893_s22 = sshll.u32 %s1360_s12, 7 }
 0x177   : > { %s1866_s24 = sld [smem:[#allocation27_spill]]  ;;  %s703_s11 = sshll.u32 %s1655_s15, 4  ;;  %s704_s11 = int_to_ptr.vmem [resolvable:$true] %s703_s11 }
 0x178   : > { %s1867_s21 = sand.u32 1, %s1336_s28   ;;  %s1244_s27 = scalar_lea.vmem %s704_s11, 128 }
 0x179   : > { %s690_s20 = scalar_lea.sflag [#allocation5], %s1867_s21  ;;  %p1245_p2 = scmp.ne.s32.totalorder %s704_s11, %s1244_s27 }
 0x17a   : > { %s1384_s19 = smov [#allocation10]  }
 0x17b   : > { %s1248_s10 = sshll.u32 %s1384_s19, 4  ;;  %s1249_s10 = int_to_ptr.vmem [resolvable:$false] %s1248_s10 }
 0x17c   : > { %p1868_p13 = scmp.ne.s32.totalorder %s1865_s26, 0  ;;  %s1250_s18 = scalar_lea.vmem %s1249_s10, 256 }
 0x17d   : > { %s701_s8 = scalar_lea.hbm %s1866_s24, %s893_s22  ;;  %p1251_p12 = scmp.lt.s32.totalorder %s704_s11, %s1249_s10 }
 0x17e   : > { %p1246_p8 = pnand %p1245_p2, %p1868_p13  ;;  %p1252_p4 = scmp.lt.s32.totalorder %s1250_s18, %s1244_s27 }
 0x180   : > { %p1247_p6 = pneg %p1246_p8  ;;  %p1253_p9 = por %p1252_p4, %p1251_p12 }
 0x182   : > { %p1254_p10 = pnand %p1253_p9, %p1247_p6 }
 0x184   : > { %1257 = shalt.err (!%p1254_p10)
}
 0x185   : > { %s1258_s12 = scalar_lea.hbm %s701_s8, 128  ;;  %s1262_s25 = scalar_lea.hbm %s1866_s24, 384 }
 0x186   : > { %p1259_p3 = scmp.ne.s32.totalorder %s701_s8, %s1258_s12  ;;  %p1263_p5 = scmp.lt.s32.totalorder %s701_s8, %s1866_s24 }
 0x187   : > { %p1264_p7 = scmp.lt.s32.totalorder %s1262_s25, %s1258_s12 }
 0x188   : > { %p1260_p0 = pnand %p1259_p3, %p1868_p13 }
 0x189   : > { %p1265_p11 = por %p1264_p7, %p1263_p5 }
 0x18a   : > { %p1261_p1 = pneg %p1260_p0 }
 0x18c   : > { %p1266_p2 = pnand %p1265_p11, %p1261_p1 }
 0x18e   : > { %1269 = shalt.err (!%p1266_p2)
}
 0x18f   : > { %1014 = dma.vmem_to_hbm [thread:$0]  (%p1868_p13), %s704_s11, 128, %s701_s8, %s690_s20  }
 0x190 PF: > { %s1869_s30 = sld [smem:[#allocation19_spill]] }
 0x191   : > { %s1870_s22 = sld [smem:[#allocation15_spill]] }
 0x192   : > { %s1871_s7 = sld [smem:[#allocation25_spill]] }
 0x196   : > { %p1039_p8 = scmp.ge.s32.totalorder %s1869_s30, 2 }
 0x197   : > { %s715_s29 = sand.u32 1, %s1870_s22  }
 0x198   : > { %p1872_p6 = scmp.ne.s32.totalorder %s1871_s7, 0  ;;  %s716_s21 = scalar_lea.sflag [#allocation5], %s715_s29 }
 0x19a   : > { %p1031_p12 = pnand %p1039_p8, %p1872_p6 }
 0x19c   : > { %p1032_p4 = pneg %p1031_p12 }
 0x19e   : > { %1327 = dma.done.wait (%p1032_p4), %s716_s21, 128  }
 0x19f   : > { %1329 = vsyncadd (%p1032_p4), %s716_s21, 4294967168  ;;  %s23_s15 = sadd.s32 1, %s1869_s30   ;;  %s1873_s19 = sld [smem:[#allocation16_spill]] }
 0x1a0   : > { %p20_p9 = scmp.ge.s32.totalorder %s23_s15, 8   ;;  %s1874_s29 = sld [smem:[#allocation23_spill]] }
 0x1a1   : > { %s1875_s26 = sld [smem:[#allocation17_spill]]  ;;  %s1879_s27 = smov %s1336_s28 }
 0x1a2   : > { %s1876_s10 = sld [smem:[#allocation24_spill]]  ;;  %s1881_s30 = smov %s1348_s9 }
 0x1a3   : > { %s1877_s8 = sld [smem:[#allocation20_spill]]  ;;  %s1883_s11 = smov %s1364_s13 }
 0x1a4   : > { %s1878_s20 = sld [smem:[#allocation21_spill]]  ;;  %s1884_s12 = smov %s1368_s14 }
 0x1a5   : > { %s1880_s28 = smov %s1873_s19 }
 0x1a6   :  { %22 = sbr.rel (!%p20_p9) target bundleno = 12 (0xc), region = 137 }
 0x1a7   : > { %s1882_s9 = smov %s1875_s26 }
 0x1a9   : > { %s1885_s13 = smov %s1877_s8 }
 0x1aa   : > { %s1886_s14 = smov %s1878_s20 }
 0x1ab   :  { %721 = vsyncpa [#allocation4], 1 }
 0x1ac   :  { %723 = vsyncpa [#allocation4 + $0x1], 1 }
 0x1ad   :  { %724 = vsyncpa [#allocation7], 1 }
 0x1ae   :  { %725 = vsyncpa [#allocation5], 1 }
 0x1af   :  { %727 = vsyncpa [#allocation5 + $0x1], 1 }

</bundles_post_ra>
